<compile_context>
chip_gen: v7x
topology: tpu7x:2x2x1
jax: 0.10.0
libtpu: 0.0.40
codegen_flags: <defaults>
</compile_context>

<pallas_src>
import functools

import jax
import jax.numpy as jnp
from jax.experimental import pallas as pl
from jax.experimental.pallas import tpu as pltpu

EPS = 1e-5          # nn.GroupNorm default eps
NEG_SLOPE = 0.01    # nn.LeakyReLU default negative_slope


def _leaky(x):
    return jnp.where(x > 0, x, NEG_SLOPE * x)


# ----------------------------- Pallas kernels ------------------------------ #

def norm1_fold_kernel(x_ref, g_ref, b_ref, af_ref):
    """GroupNorm(1, C) statistics over a (1, C, HW) block; emits folded affine rows.

    af[0] = a1 = rstd * g   (row, 1 x C)
    af[1] = c1 = beta - mu * a1
    af[2] = mu (broadcast over C) -- used downstream as the GN2 shift.
    Two-pass variance (x is fully VMEM-resident) avoids E[x^2]-mu^2 cancellation.
    """
    x = x_ref[0]                                   # (C, HW) f32
    C = x.shape[0]
    n = C * x.shape[1]
    mu = jnp.sum(x) * (1.0 / n)
    d = x - mu
    var = jnp.sum(d * d) * (1.0 / n)
    rstd = jax.lax.rsqrt(var + EPS)
    a_row = rstd * g_ref[...]                      # (1, C)
    c_row = b_ref[...] - mu * a_row                # (1, C)
    af_ref[0, 0:1, :] = a_row
    af_ref[0, 1:2, :] = c_row
    af_ref[0, 2:3, :] = jnp.zeros((1, C), jnp.float32) + mu


def fused_io_mlp_kernel(x_ref, spec_ref, af_ref, pcol_ref, prow_ref,
                        wsk_ref, w1_ref, b1_ref, w2_ref, o_ref,
                        *, hw_chunk, hw_true):
    """out = y + ls2 * Mlp(GroupNorm2(y)),  y = x + ls1*leaky(spec + skip(xn1)).

    GN1 / GN2 affines are folded into the 1x1-conv weights once per batch:
        W @ (v*a + c) + b  ==  (W * a^T) @ v + (W @ c + b)
    Phase 1 streams HW chunks: builds y into the resident output block, skips the
    per-chunk affine FMAs, and accumulates mean-shifted (C,128) VPU partial sums
    for the GN2 statistics (single XLU reduce after the loop).  Phase 2 streams
    the chunks again through the MLP (bf16 MXU operands, f32 accumulation) and
    adds the residual in place.  Padded lanes (hw >= hw_true) are masked out of
    the statistics only; their outputs are sliced away by the wrapper.
    """
    C = x_ref.shape[1]
    HW = x_ref.shape[2]
    n_chunks = HW // hw_chunk
    n_sub = hw_chunk // 128
    padded = hw_true != HW
    inv_n = 1.0 / float(C * hw_true)
    unroll = n_chunks if n_chunks <= 8 else 2      # keep the loop visible to the scheduler

    # ---- per-batch GN1 folded affine (row layout) + batch mean of x ----
    a1_row = af_ref[0, 0:1, :]                     # (1, C)
    c1_row = af_ref[0, 1:2, :]                     # (1, C)
    mu1 = af_ref[0, 2:3, 0:1]                      # (1, 1) -- GN2 stat shift

    bsk = pcol_ref[:, 0:1]                         # (C, 1)
    ls1 = pcol_ref[:, 1:2]
    b2 = pcol_ref[:, 2:3]
    ls2 = pcol_ref[:, 3:4]
    g2_row = prow_ref[0:1, :]                      # (1, C)
    bt2_row = prow_ref[1:2, :]                     # (1, C)

    wsk = wsk_ref[...]                             # (C, C) f32
    wsk_eff = (wsk * a1_row).astype(jnp.bfloat16)                       # fold GN1 scale
    bsk_eff = jnp.sum(wsk * c1_row, axis=1, keepdims=True) + bsk        # fold GN1 shift

    def _off(i):
        return pl.multiple_of(i * hw_chunk, 128)

    # ---- phase 1: y = x + ls1*leaky(spec + skip); shifted GN2 statistics ----
    def phase1(i, carry):
        s_v, ss_v = carry                          # (C, 128) f32 each
        off = _off(i)
        x_c = x_ref[0, :, pl.ds(off, hw_chunk)]                        # (C, chunk) f32
        spec_c = spec_ref[0, :, pl.ds(off, hw_chunk)].astype(jnp.float32)
        skip = jnp.dot(wsk_eff, x_c.astype(jnp.bfloat16),
                       preferred_element_type=jnp.float32) + bsk_eff
        y_c = x_c + ls1 * _leaky(spec_c + skip)
        o_ref[0, :, pl.ds(off, hw_chunk)] = y_c    # y lives in the output block
        d = y_c - mu1                              # shift ~ mean(y): no cancellation
        if padded:
            lane = jax.lax.broadcasted_iota(jnp.int32, (C, hw_chunk), 1) + off
            d = jnp.where(lane < hw_true, d, 0.0)
        d2 = d * d
        # per-128-lane partial sums: pure VPU adds; XLU reduce happens once after the loop
        for j in range(n_sub):
            s_v = s_v + d[:, j * 128:(j + 1) * 128]
            ss_v = ss_v + d2[:, j * 128:(j + 1) * 128]
        return s_v, ss_v

    zeros = jnp.zeros((C, 128), jnp.float32)
    s_v, ss_v = jax.lax.fori_loop(0, n_chunks, phase1, (zeros, zeros), unroll=unroll)

    # ---- GroupNorm2 folded affine (shifted single-pass stats, exact) ----
    mean_d = jnp.sum(s_v) * inv_n
    var = jnp.maximum(jnp.sum(ss_v) * inv_n - mean_d * mean_d, 0.0)
    rstd = jax.lax.rsqrt(var + EPS)
    a2_row = rstd * g2_row                          # (1, C)
    c2_row = bt2_row - (mu1 + mean_d) * a2_row      # (1, C)

    w1 = w1_ref[...]                                # (Hd, C) f32
    w1_eff = (w1 * a2_row).astype(jnp.bfloat16)                          # fold GN2 scale
    b1_eff = jnp.sum(w1 * c2_row, axis=1, keepdims=True) + b1_ref[...]   # (Hd, 1)
    w2 = w2_ref[...]                                # (C, Hd) bf16

    # ---- phase 2: out = y + ls2 * (W2 @ leaky(W1_eff @ y + b1_eff) + b2), streamed ----
    def phase2(i, carry):
        off = _off(i)
        y_c = o_ref[0, :, pl.ds(off, hw_chunk)]     # (C, chunk) f32
        h = _leaky(jnp.dot(w1_eff, y_c.astype(jnp.bfloat16),
                           preferred_element_type=jnp.float32) + b1_eff)
        m = jnp.dot(w2, h.astype(jnp.bfloat16),
                    preferred_element_type=jnp.float32) + b2
        o_ref[0, :, pl.ds(off, hw_chunk)] = y_c + ls2 * m
        return carry

    jax.lax.fori_loop(0, n_chunks, phase2, 0, unroll=unroll)


# ------------------------------ pallas_call glue ---------------------------- #

def _vmem_capacity():
    """Physical VMEM bytes of the current chip (conservative fallback)."""
    try:
        return int(pltpu.get_tpu_info().vmem_capacity_bytes)
    except Exception:
        return 64 << 20          # safe on every generation (v7x has 64 MiB per TC)


def _compiler_params(vmem_bytes_est):
    kw = dict(dimension_semantics=("parallel",))
    cap = _vmem_capacity()
    # Default scoped VMEM is 16 MiB on v5e and 32 MiB on v6e/v7x: raise whenever the
    # working set exceeds the smallest default, clamp to ~85% of physical capacity,
    # and never lower the limit below the largest default (32 MiB).
    if vmem_bytes_est > (16 << 20):
        kw["vmem_limit_bytes"] = int(min(max(vmem_bytes_est * 5 // 4, 32 << 20),
                                         cap * 85 // 100))
    return pltpu.CompilerParams(**kw)


def _pick_chunk(hw, target):
    """Largest 128-multiple <= target that divides hw (hw is a multiple of 128)."""
    if hw <= target:
        return hw
    c = (target // 128) * 128
    while c >= 128:
        if hw % c == 0:
            return c
        c -= 128
    return 128


# --------------------------- spectral conv (plain JAX) ---------------------- #
# TODO(synk): FFT has no Pallas equivalent; the IO_layer spectral convolution
# (rfft2 -> complex mode mixing -> irfft2) is done in plain JAX.

def spectral_conv2d(x, w1r, w1i, w2r, w2i, modes):
    # x: [B, C, H, W] float32
    B, C, H, W = x.shape
    assert 2 * modes <= H and modes <= W // 2 + 1, "mode corners must not overlap"
    x_ft = jnp.fft.rfft2(x, axes=(-2, -1))
    w1 = w1r + 1j * w1i
    w2 = w2r + 1j * w2i
    out_ft = jnp.zeros((B, C, H, W // 2 + 1), dtype=jnp.complex64)
    out_ft = out_ft.at[:, :, :modes, :modes].set(
        jnp.einsum('bixy,ioxy->boxy', x_ft[:, :, :modes, :modes], w1))
    out_ft = out_ft.at[:, :, -modes:, :modes].set(
        jnp.einsum('bixy,ioxy->boxy', x_ft[:, :, -modes:, :modes], w2))
    return jnp.fft.irfft2(out_ft, s=(H, W), axes=(-2, -1)).astype(jnp.float32)


def spectral_conv2d_gn(x, a1, c1, w1r, w1i, w2r, w2i, modes):
    """Spectral conv of GroupNorm1(x) with GN1 folded into the spectrum.

    rfft2 is linear per channel: rfft2(a*x + c) = a*rfft2(x) + c*H*W at the DC mode.
    Avoids materializing xn1 in HBM entirely.
    """
    B, C, H, W = x.shape
    assert 2 * modes <= H and modes <= W // 2 + 1, "mode corners must not overlap"
    x_ft = jnp.fft.rfft2(x, axes=(-2, -1))
    x_ft = x_ft * a1[:, :, None, None]
    x_ft = x_ft.at[:, :, 0, 0].add((c1 * (H * W)).astype(x_ft.dtype))
    w1 = w1r + 1j * w1i
    w2 = w2r + 1j * w2i
    out_ft = jnp.zeros((B, C, H, W // 2 + 1), dtype=jnp.complex64)
    out_ft = out_ft.at[:, :, :modes, :modes].set(
        jnp.einsum('bixy,ioxy->boxy', x_ft[:, :, :modes, :modes], w1))
    out_ft = out_ft.at[:, :, -modes:, :modes].set(
        jnp.einsum('bixy,ioxy->boxy', x_ft[:, :, -modes:, :modes], w2))
    return jnp.fft.irfft2(out_ft, s=(H, W), axes=(-2, -1)).astype(jnp.float32)


# ------------------------------- parameters --------------------------------- #

def init_params(key, C, modes, mlp_ratio=4, layer_scale_init_value=1e-5):
    Hd = int(C * mlp_ratio)
    ks = jax.random.split(key, 10)

    def trunc(k, shape, std=0.02):
        return (std * jax.random.truncated_normal(k, -2.0, 2.0, shape)).astype(jnp.float32)

    scale = 1.0 / (C * C)
    p = {
        # spectral conv weights (complex, split into real/imag)
        "sc_w1r": scale * jax.random.uniform(ks[0], (C, C, modes, modes), jnp.float32),
        "sc_w1i": scale * jax.random.uniform(ks[1], (C, C, modes, modes), jnp.float32),
        "sc_w2r": scale * jax.random.uniform(ks[2], (C, C, modes, modes), jnp.float32),
        "sc_w2i": scale * jax.random.uniform(ks[3], (C, C, modes, modes), jnp.float32),
        # IO-layer 1x1 skip conv
        "w_skip": trunc(ks[4], (C, C)),
        "b_skip": jnp.zeros((C, 1), jnp.float32),
        # GroupNorm affines
        "g1": jnp.ones((C, 1), jnp.float32), "bta1": jnp.zeros((C, 1), jnp.float32),
        "g2": jnp.ones((C, 1), jnp.float32), "bta2": jnp.zeros((C, 1), jnp.float32),
        # Mlp (1x1 convs)
        "w_fc1": trunc(ks[5], (Hd, C)), "b_fc1": jnp.zeros((Hd, 1), jnp.float32),
        "w_fc2": trunc(ks[6], (C, Hd)), "b_fc2": jnp.zeros((C, 1), jnp.float32),
        # layer scales
        "ls1": layer_scale_init_value * jnp.ones((C, 1), jnp.float32),
        "ls2": layer_scale_init_value * jnp.ones((C, 1), jnp.float32),
    }
    return p


# ------------------------------ forward pass -------------------------------- #

@functools.partial(jax.jit, static_argnames=("modes",))
def noformer_block(x_nchw, params, modes):
    B, C, H, W = x_nchw.shape
    HW = H * W
    Hd = params["w_fc1"].shape[0]
    x = x_nchw.reshape(B, C, HW).astype(jnp.float32)
    fp32 = 4

    # --- GN1 statistics / folded affine (Pallas); no xn1 HBM materialization ---
    afold = pl.pallas_call(
        norm1_fold_kernel,
        out_shape=jax.ShapeDtypeStruct((B, 3, C), jnp.float32),
        grid=(B,),
        in_specs=[pl.BlockSpec((1, C, HW), lambda b: (b, 0, 0)),
                  pl.BlockSpec((1, C), lambda b: (0, 0)),
                  pl.BlockSpec((1, C), lambda b: (0, 0))],
        out_specs=pl.BlockSpec((1, 3, C), lambda b: (b, 0, 0)),
        compiler_params=_compiler_params(4 * C * HW * fp32 + (1 << 20)),
        cost_estimate=pl.CostEstimate(flops=5 * B * C * HW, transcendentals=0,
                                      bytes_accessed=B * C * HW * fp32),
    )(x, params["g1"].reshape(1, C), params["bta1"].reshape(1, C))

    a1 = afold[:, 0, :]                             # (B, C)
    c1 = afold[:, 1, :]

    # --- spectral conv with GN1 folded into the FFT (plain JAX), bf16 output ---
    spec = spectral_conv2d_gn(x.reshape(B, C, H, W), a1, c1,
                              params["sc_w1r"], params["sc_w1i"],
                              params["sc_w2r"], params["sc_w2i"], modes)
    spec = spec.reshape(B, C, HW).astype(jnp.bfloat16)

    # --- pad HW to a lane multiple: lane-dense stores, bounded mlp hidden ---
    HWp = ((HW + 127) // 128) * 128
    if HWp != HW:
        pad = ((0, 0), (0, 0), (0, HWp - HW))
        x_p = jnp.pad(x, pad)
        spec_p = jnp.pad(spec, pad)
    else:
        x_p, spec_p = x, spec

    cap = _vmem_capacity()
    target = 1024 if cap >= (96 << 20) else 512     # wide chunks on 128 MiB chips
    hw_chunk = _pick_chunk(HWp, target)

    # packed tiny parameters: fewer DMA descriptors / VMEM tiles
    pcol = jnp.concatenate([params["b_skip"], params["ls1"],
                            params["b_fc2"], params["ls2"]], axis=1)      # (C, 4)
    prow = jnp.concatenate([params["g2"].reshape(1, C),
                            params["bta2"].reshape(1, C)], axis=0)        # (2, C)

    flops = 2 * B * HWp * (C * C + 2 * C * Hd) + 20 * B * C * HWp
    bytes_acc = B * C * HWp * (fp32 + 2 + fp32)     # x read f32, spec read bf16, out write f32
    vmem_est = (2 * 2 * C * HWp * fp32 + 2 * C * HWp * 2
                + (C * C + Hd * C) * fp32 + C * Hd * 2
                + (Hd + 8 * C) * hw_chunk * fp32 + (1 << 20))

    per_b = pl.BlockSpec((1, C, HWp), lambda b: (b, 0, 0))

    def rep(shape):
        return pl.BlockSpec(shape, lambda b: tuple(0 for _ in shape))

    out = pl.pallas_call(
        functools.partial(fused_io_mlp_kernel, hw_chunk=hw_chunk, hw_true=HW),
        out_shape=jax.ShapeDtypeStruct((B, C, HWp), jnp.float32),
        grid=(B,),
        in_specs=[
            per_b,                                   # x (f32)
            pl.BlockSpec((1, C, HWp), lambda b: (b, 0, 0)),   # spec (bf16)
            pl.BlockSpec((1, 3, C), lambda b: (b, 0, 0)),     # afold (a1,c1,mu1 rows)
            rep((C, 4)),                             # pcol: b_skip, ls1, b_fc2, ls2
            rep((2, C)),                             # prow: g2, bta2
            rep((C, C)),                             # w_skip (f32, folded in-kernel)
            rep((Hd, C)),                            # w_fc1  (f32, folded in-kernel)
            rep((Hd, 1)),                            # b_fc1
            rep((C, Hd)),                            # w_fc2  (bf16)
        ],
        out_specs=per_b,
        input_output_aliases={0: 0},                 # out reuses x's HBM buffer
        compiler_params=_compiler_params(vmem_est),
        cost_estimate=pl.CostEstimate(flops=flops, transcendentals=0,
                                      bytes_accessed=bytes_acc),
    )(x_p, spec_p, afold, pcol, prow,
      params["w_skip"], params["w_fc1"], params["b_fc1"],
      params["w_fc2"].astype(jnp.bfloat16))

    return out[:, :, :HW].reshape(B, C, H, W)


# --------------------------- pure-JAX reference ------------------------------ #

def _gn_ref(v, g, b):       # v: (B, C, HW); g, b: (C, 1)
    mu = jnp.mean(v, axis=(1, 2), keepdims=True)
    var = jnp.mean((v - mu) ** 2, axis=(1, 2), keepdims=True)
    return (v - mu) * jax.lax.rsqrt(var + EPS) * g[None] + b[None]


def noformer_block_ref(x_nchw, params, modes):
    B, C, H, W = x_nchw.shape
    HW = H * W
    x = x_nchw.reshape(B, C, HW).astype(jnp.float32)
    xn1 = _gn_ref(x, params["g1"], params["bta1"])
    spec = spectral_conv2d(xn1.reshape(B, C, H, W),
                           params["sc_w1r"], params["sc_w1i"],
                           params["sc_w2r"], params["sc_w2i"], modes).reshape(B, C, HW)
    skip = jnp.einsum('oc,bcs->bos', params["w_skip"], xn1) + params["b_skip"][None]
    y = x + params["ls1"][None] * _leaky(spec + skip)
    xn2 = _gn_ref(y, params["g2"], params["bta2"])
    h = _leaky(jnp.einsum('hc,bcs->bhs', params["w_fc1"], xn2) + params["b_fc1"][None])
    m = jnp.einsum('ch,bhs->bcs', params["w_fc2"], h) + params["b_fc2"][None]
    out = y + params["ls2"][None] * m
    return out.reshape(B, C, H, W)


if __name__ == "__main__":
    B, C, H, W = 2, 8, 16, 16
    modes = 4            # wavenumber
    key = jax.random.PRNGKey(0)
    kx, kp = jax.random.split(key)
    x = jax.random.normal(kx, (B, C, H, W), jnp.float32)
    params = init_params(kp, C, modes)

    out = noformer_block(x, params, modes)
    out = jax.block_until_ready(out)
    assert out.shape == (B, C, H, W)
    assert jnp.all(jnp.isfinite(out))

    ref = noformer_block_ref(x, params, modes)
    err = float(jnp.max(jnp.abs(out - ref)))
    assert err < 1e-3, f"max abs err vs reference: {err}"
    print("KERNEL_OK")
</pallas_src>

<mosaic_0001>
module attributes {stable_mosaic.version = 11 : i64} {
  func.func @norm1_fold_kernel(%arg0: i32, %arg1: memref<1x8x256xf32, #tpu.memory_space<vmem>>, %arg2: memref<1x8xf32, #tpu.memory_space<vmem>>, %arg3: memref<1x8xf32, #tpu.memory_space<vmem>>, %arg4: memref<1x3x8xf32, #tpu.memory_space<vmem>>) attributes {dimension_semantics = [#tpu.dimension_semantics<parallel>], iteration_bounds = array<i64: 2>, scalar_prefetch = 0 : i64, scratch_operands = 0 : i64, tpu.core_type = #tpu.core_type<tc>, window_params = [{transform_indices = @transform_0, window_bounds = array<i64: 1, 8, 256>}, {pipeline_mode = #tpu.pipeline_mode<synchronous>, transform_indices = @transform_1, window_bounds = array<i64: 1, 8>}, {pipeline_mode = #tpu.pipeline_mode<synchronous>, transform_indices = @transform_2, window_bounds = array<i64: 1, 8>}, {transform_indices = @transform_3, window_bounds = array<i64: 1, 3, 8>}]} {
    %c0 = arith.constant 0 : index
    %c0_0 = arith.constant 0 : index
    %c0_1 = arith.constant 0 : index
    %0 = vector.load %arg1[%c0, %c0_0, %c0_1] : memref<1x8x256xf32, #tpu.memory_space<vmem>>, vector<1x8x256xf32>
    %1 = vector.shape_cast %0 : vector<1x8x256xf32> to vector<8x256xf32>
    %2 = vector.shape_cast %1 : vector<8x256xf32> to vector<1x8x256xf32>
    %cst = arith.constant dense<0.000000e+00> : vector<1xf32>
    %3 = vector.multi_reduction <add>, %2, %cst [1, 2] : vector<1x8x256xf32> to vector<1xf32>
    %4 = vector.shape_cast %3 : vector<1xf32> to vector<1x1x1xf32>
    %5 = vector.extract %4[0, 0, 0] : f32 from vector<1x1x1xf32>
    %cst_2 = arith.constant 4.8828125E-4 : f32
    %6 = arith.mulf %5, %cst_2 : f32
    %7 = vector.broadcast %6 : f32 to vector<8x256xf32>
    %8 = arith.subf %1, %7 : vector<8x256xf32>
    %9 = arith.mulf %8, %8 : vector<8x256xf32>
    %10 = vector.shape_cast %9 : vector<8x256xf32> to vector<1x8x256xf32>
    %cst_3 = arith.constant dense<0.000000e+00> : vector<1xf32>
    %11 = vector.multi_reduction <add>, %10, %cst_3 [1, 2] : vector<1x8x256xf32> to vector<1xf32>
    %12 = vector.shape_cast %11 : vector<1xf32> to vector<1x1x1xf32>
    %13 = vector.extract %12[0, 0, 0] : f32 from vector<1x1x1xf32>
    %cst_4 = arith.constant 4.8828125E-4 : f32
    %14 = arith.mulf %13, %cst_4 : f32
    %cst_5 = arith.constant 9.99999974E-6 : f32
    %15 = arith.addf %14, %cst_5 : f32
    %16 = math.rsqrt %15 : f32
    %c0_6 = arith.constant 0 : index
    %c0_7 = arith.constant 0 : index
    %17 = vector.load %arg2[%c0_6, %c0_7] : memref<1x8xf32, #tpu.memory_space<vmem>>, vector<1x8xf32>
    %18 = vector.broadcast %16 : f32 to vector<1x8xf32>
    %19 = arith.mulf %18, %17 : vector<1x8xf32>
    %c0_8 = arith.constant 0 : index
    %c0_9 = arith.constant 0 : index
    %20 = vector.load %arg3[%c0_8, %c0_9] : memref<1x8xf32, #tpu.memory_space<vmem>>, vector<1x8xf32>
    %21 = vector.broadcast %6 : f32 to vector<1x8xf32>
    %22 = arith.mulf %21, %19 : vector<1x8xf32>
    %23 = arith.subf %20, %22 : vector<1x8xf32>
    %c0_10 = arith.constant 0 : index
    %c0_11 = arith.constant 0 : index
    %c0_12 = arith.constant 0 : index
    %24 = vector.load %arg4[%c0_10, %c0_11, %c0_12] : memref<1x3x8xf32, #tpu.memory_space<vmem>>, vector<1x1x8xf32>
    %25 = vector.shape_cast %24 : vector<1x1x8xf32> to vector<1x8xf32>
    %26 = vector.shape_cast %19 : vector<1x8xf32> to vector<1x1x8xf32>
    tpu.vector_store %arg4[%c0_10, %c0_11, %c0_12], %26 {strides = array<i32>} : memref<1x3x8xf32, #tpu.memory_space<vmem>>, vector<1x1x8xf32>,
    %c0_13 = arith.constant 0 : index
    %c1 = arith.constant 1 : index
    %c0_14 = arith.constant 0 : index
    %27 = vector.load %arg4[%c0_13, %c1, %c0_14] : memref<1x3x8xf32, #tpu.memory_space<vmem>>, vector<1x1x8xf32>
    %28 = vector.shape_cast %27 : vector<1x1x8xf32> to vector<1x8xf32>
    %29 = vector.shape_cast %23 : vector<1x8xf32> to vector<1x1x8xf32>
    tpu.vector_store %arg4[%c0_13, %c1, %c0_14], %29 {strides = array<i32>} : memref<1x3x8xf32, #tpu.memory_space<vmem>>, vector<1x1x8xf32>,
    %cst_15 = arith.constant 0.000000e+00 : f32
    %30 = vector.broadcast %cst_15 : f32 to vector<1x8xf32>
    %31 = vector.broadcast %6 : f32 to vector<1x8xf32>
    %32 = arith.addf %30, %31 : vector<1x8xf32>
    %c0_16 = arith.constant 0 : index
    %c2 = arith.constant 2 : index
    %c0_17 = arith.constant 0 : index
    %33 = vector.load %arg4[%c0_16, %c2, %c0_17] : memref<1x3x8xf32, #tpu.memory_space<vmem>>, vector<1x1x8xf32>
    %34 = vector.shape_cast %33 : vector<1x1x8xf32> to vector<1x8xf32>
    %35 = vector.shape_cast %32 : vector<1x8xf32> to vector<1x1x8xf32>
    tpu.vector_store %arg4[%c0_16, %c2, %c0_17], %35 {strides = array<i32>} : memref<1x3x8xf32, #tpu.memory_space<vmem>>, vector<1x1x8xf32>,
    return
  }
  func.func @transform_0(%arg0: i32) -> (i32, i32, i32) {
    %c0_i32 = arith.constant 0 : i32
    %c0_i32_0 = arith.constant 0 : i32
    %c0_i32_1 = arith.constant 0 : i32
    return %arg0, %c0_i32, %c0_i32_0 : i32, i32, i32
  }
  func.func @transform_1(%arg0: i32) -> (i32, i32) {
    %c0_i32 = arith.constant 0 : i32
    %c0_i32_0 = arith.constant 0 : i32
    %c0_i32_1 = arith.constant 0 : i32
    return %c0_i32, %c0_i32_0 : i32, i32
  }
  func.func @transform_2(%arg0: i32) -> (i32, i32) {
    %c0_i32 = arith.constant 0 : i32
    %c0_i32_0 = arith.constant 0 : i32
    %c0_i32_1 = arith.constant 0 : i32
    return %c0_i32, %c0_i32_0 : i32, i32
  }
  func.func @transform_3(%arg0: i32) -> (i32, i32, i32) {
    %c0_i32 = arith.constant 0 : i32
    %c0_i32_0 = arith.constant 0 : i32
    %c0_i32_1 = arith.constant 0 : i32
    return %arg0, %c0_i32, %c0_i32_0 : i32, i32, i32
  }
}

module attributes {stable_mosaic.version = 11 : i64} {
  func.func @fused_io_mlp_kernel(%arg0: i32, %arg1: memref<1x8x256xf32, #tpu.memory_space<vmem>>, %arg2: memref<1x8x256xbf16, #tpu.memory_space<vmem>>, %arg3: memref<1x3x8xf32, #tpu.memory_space<vmem>>, %arg4: memref<8x4xf32, #tpu.memory_space<vmem>>, %arg5: memref<2x8xf32, #tpu.memory_space<vmem>>, %arg6: memref<8x8xf32, #tpu.memory_space<vmem>>, %arg7: memref<32x8xf32, #tpu.memory_space<vmem>>, %arg8: memref<32x1xf32, #tpu.memory_space<vmem>>, %arg9: memref<8x32xbf16, #tpu.memory_space<vmem>>, %arg10: memref<1x8x256xf32, #tpu.memory_space<vmem>>) attributes {dimension_semantics = [#tpu.dimension_semantics<parallel>], iteration_bounds = array<i64: 2>, scalar_prefetch = 0 : i64, scratch_operands = 0 : i64, tpu.core_type = #tpu.core_type<tc>, window_params = [{transform_indices = @transform_0, window_bounds = array<i64: 1, 8, 256>}, {transform_indices = @transform_1, window_bounds = array<i64: 1, 8, 256>}, {transform_indices = @transform_2, window_bounds = array<i64: 1, 3, 8>}, {pipeline_mode = #tpu.pipeline_mode<synchronous>, transform_indices = @transform_3, window_bounds = array<i64: 8, 4>}, {pipeline_mode = #tpu.pipeline_mode<synchronous>, transform_indices = @transform_4, window_bounds = array<i64: 2, 8>}, {pipeline_mode = #tpu.pipeline_mode<synchronous>, transform_indices = @transform_5, window_bounds = array<i64: 8, 8>}, {pipeline_mode = #tpu.pipeline_mode<synchronous>, transform_indices = @transform_6, window_bounds = array<i64: 32, 8>}, {pipeline_mode = #tpu.pipeline_mode<synchronous>, transform_indices = @transform_7, window_bounds = array<i64: 32, 1>}, {pipeline_mode = #tpu.pipeline_mode<synchronous>, transform_indices = @transform_8, window_bounds = array<i64: 8, 32>}, {transform_indices = @transform_9, window_bounds = array<i64: 1, 8, 256>}]} {
    %c0 = arith.constant 0 : index
    %c0_0 = arith.constant 0 : index
    %c0_1 = arith.constant 0 : index
    %0 = vector.load %arg3[%c0, %c0_0, %c0_1] : memref<1x3x8xf32, #tpu.memory_space<vmem>>, vector<1x1x8xf32>
    %1 = vector.shape_cast %0 : vector<1x1x8xf32> to vector<1x8xf32>
    %c0_2 = arith.constant 0 : index
    %c1 = arith.constant 1 : index
    %c0_3 = arith.constant 0 : index
    %2 = vector.load %arg3[%c0_2, %c1, %c0_3] : memref<1x3x8xf32, #tpu.memory_space<vmem>>, vector<1x1x8xf32>
    %3 = vector.shape_cast %2 : vector<1x1x8xf32> to vector<1x8xf32>
    %c0_4 = arith.constant 0 : index
    %c2 = arith.constant 2 : index
    %c0_5 = arith.constant 0 : index
    %4 = vector.load %arg3[%c0_4, %c2, %c0_5] : memref<1x3x8xf32, #tpu.memory_space<vmem>>, vector<1x1x1xf32>
    %5 = vector.shape_cast %4 : vector<1x1x1xf32> to vector<1x1xf32>
    %c0_6 = arith.constant 0 : index
    %c0_7 = arith.constant 0 : index
    %6 = vector.load %arg4[%c0_6, %c0_7] : memref<8x4xf32, #tpu.memory_space<vmem>>, vector<8x1xf32>
    %c0_8 = arith.constant 0 : index
    %c1_9 = arith.constant 1 : index
    %7 = vector.load %arg4[%c0_8, %c1_9] : memref<8x4xf32, #tpu.memory_space<vmem>>, vector<8x1xf32>
    %c0_10 = arith.constant 0 : index
    %c2_11 = arith.constant 2 : index
    %8 = vector.load %arg4[%c0_10, %c2_11] : memref<8x4xf32, #tpu.memory_space<vmem>>, vector<8x1xf32>
    %c0_12 = arith.constant 0 : index
    %c3 = arith.constant 3 : index
    %9 = vector.load %arg4[%c0_12, %c3] : memref<8x4xf32, #tpu.memory_space<vmem>>, vector<8x1xf32>
    %c0_13 = arith.constant 0 : index
    %c0_14 = arith.constant 0 : index
    %10 = vector.load %arg5[%c0_13, %c0_14] : memref<2x8xf32, #tpu.memory_space<vmem>>, vector<1x8xf32>
    %c1_15 = arith.constant 1 : index
    %c0_16 = arith.constant 0 : index
    %11 = vector.load %arg5[%c1_15, %c0_16] : memref<2x8xf32, #tpu.memory_space<vmem>>, vector<1x8xf32>
    %c0_17 = arith.constant 0 : index
    %c0_18 = arith.constant 0 : index
    %12 = vector.load %arg6[%c0_17, %c0_18] : memref<8x8xf32, #tpu.memory_space<vmem>>, vector<8x8xf32>
    %13 = vector.broadcast %1 : vector<1x8xf32> to vector<8x8xf32>
    %14 = arith.mulf %12, %13 : vector<8x8xf32>
    %15 = arith.truncf %14 : vector<8x8xf32> to vector<8x8xbf16>
    %16 = vector.broadcast %3 : vector<1x8xf32> to vector<8x8xf32>
    %17 = arith.mulf %12, %16 : vector<8x8xf32>
    %cst = arith.constant dense<0.000000e+00> : vector<8xf32>
    %18 = vector.multi_reduction <add>, %17, %cst [1] : vector<8x8xf32> to vector<8xf32>
    %19 = vector.shape_cast %18 : vector<8xf32> to vector<8x1xf32>
    %20 = arith.addf %19, %6 : vector<8x1xf32>
    %cst_19 = arith.constant 0.000000e+00 : f32
    %21 = vector.broadcast %cst_19 : f32 to vector<8x128xf32>
    %c0_i32 = arith.constant 0 : i32
    %c256_i32 = arith.constant 256 : i32
    %22 = arith.muli %c0_i32, %c256_i32 : i32
    %23 = tpu.assume_multiple %22, 128 : i32
    %c0_20 = arith.constant 0 : index
    %c0_21 = arith.constant 0 : index
    %24 = arith.index_cast %23 : i32 to index
    %25 = vector.load %arg1[%c0_20, %c0_21, %24] : memref<1x8x256xf32, #tpu.memory_space<vmem>>, vector<1x8x256xf32>
    %26 = vector.shape_cast %25 : vector<1x8x256xf32> to vector<8x256xf32>
    %c0_22 = arith.constant 0 : index
    %c0_23 = arith.constant 0 : index
    %27 = arith.index_cast %23 : i32 to index
    %28 = vector.load %arg2[%c0_22, %c0_23, %27] : memref<1x8x256xbf16, #tpu.memory_space<vmem>>, vector<1x8x256xbf16>
    %29 = vector.shape_cast %28 : vector<1x8x256xbf16> to vector<8x256xbf16>
    %30 = arith.extf %29 : vector<8x256xbf16> to vector<8x256xf32>
    %31 = arith.truncf %26 : vector<8x256xf32> to vector<8x256xbf16>
    %cst_24 = arith.constant dense<0.000000e+00> : vector<8x256xf32>
    %32 = tpu.matmul %15, %31, %cst_24 {dimension_numbers = #tpu.dot_dimension_numbers<[1], [0], [0], [1], [0, 0, 1, 1], [], []>} : vector<8x8xbf16>, vector<8x256xbf16>, vector<8x256xf32> -> vector<8x256xf32>
    %33 = vector.broadcast %20 : vector<8x1xf32> to vector<8x256xf32>
    %34 = arith.addf %32, %33 : vector<8x256xf32>
    %35 = arith.addf %30, %34 : vector<8x256xf32>
    %cst_25 = arith.constant 0.000000e+00 : f32
    %36 = vector.broadcast %cst_25 : f32 to vector<8x256xf32>
    %37 = arith.cmpf ogt, %35, %36 : vector<8x256xf32>
    %cst_26 = arith.constant 0.00999999977 : f32
    %38 = vector.broadcast %cst_26 : f32 to vector<8x256xf32>
    %39 = arith.mulf %38, %35 : vector<8x256xf32>
    %40 = arith.select %37, %35, %39 : vector<8x256xi1>, vector<8x256xf32>
    %41 = vector.broadcast %7 : vector<8x1xf32> to vector<8x256xf32>
    %42 = arith.mulf %41, %40 : vector<8x256xf32>
    %43 = arith.addf %26, %42 : vector<8x256xf32>
    %c0_27 = arith.constant 0 : index
    %c0_28 = arith.constant 0 : index
    %44 = arith.index_cast %23 : i32 to index
    %45 = vector.load %arg10[%c0_27, %c0_28, %44] : memref<1x8x256xf32, #tpu.memory_space<vmem>>, vector<1x8x256xf32>
    %46 = vector.shape_cast %45 : vector<1x8x256xf32> to vector<8x256xf32>
    %47 = vector.shape_cast %43 : vector<8x256xf32> to vector<1x8x256xf32>
    tpu.vector_store %arg10[%c0_27, %c0_28, %44], %47 {strides = array<i32>} : memref<1x8x256xf32, #tpu.memory_space<vmem>>, vector<1x8x256xf32>,
    %48 = vector.broadcast %5 : vector<1x1xf32> to vector<8x256xf32>
    %49 = arith.subf %43, %48 : vector<8x256xf32>
    %50 = arith.mulf %49, %49 : vector<8x256xf32>
    %51 = vector.extract_strided_slice %49 {offsets = [0, 0], sizes = [8, 128], strides = [1, 1]} : vector<8x256xf32> to vector<8x128xf32>
    %52 = arith.addf %21, %51 : vector<8x128xf32>
    %53 = vector.extract_strided_slice %50 {offsets = [0, 0], sizes = [8, 128], strides = [1, 1]} : vector<8x256xf32> to vector<8x128xf32>
    %54 = arith.addf %21, %53 : vector<8x128xf32>
    %55 = vector.extract_strided_slice %49 {offsets = [0, 128], sizes = [8, 128], strides = [1, 1]} : vector<8x256xf32> to vector<8x128xf32>
    %56 = arith.addf %52, %55 : vector<8x128xf32>
    %57 = vector.extract_strided_slice %50 {offsets = [0, 128], sizes = [8, 128], strides = [1, 1]} : vector<8x256xf32> to vector<8x128xf32>
    %58 = arith.addf %54, %57 : vector<8x128xf32>
    %c1_i32 = arith.constant 1 : i32
    %59 = vector.shape_cast %56 : vector<8x128xf32> to vector<1x8x128xf32>
    %cst_29 = arith.constant dense<0.000000e+00> : vector<1xf32>
    %60 = vector.multi_reduction <add>, %59, %cst_29 [1, 2] : vector<1x8x128xf32> to vector<1xf32>
    %61 = vector.shape_cast %60 : vector<1xf32> to vector<1x1x1xf32>
    %62 = vector.extract %61[0, 0, 0] : f32 from vector<1x1x1xf32>
    %cst_30 = arith.constant 4.8828125E-4 : f32
    %63 = arith.mulf %62, %cst_30 : f32
    %64 = vector.shape_cast %58 : vector<8x128xf32> to vector<1x8x128xf32>
    %cst_31 = arith.constant dense<0.000000e+00> : vector<1xf32>
    %65 = vector.multi_reduction <add>, %64, %cst_31 [1, 2] : vector<1x8x128xf32> to vector<1xf32>
    %66 = vector.shape_cast %65 : vector<1xf32> to vector<1x1x1xf32>
    %67 = vector.extract %66[0, 0, 0] : f32 from vector<1x1x1xf32>
    %cst_32 = arith.constant 4.8828125E-4 : f32
    %68 = arith.mulf %67, %cst_32 : f32
    %69 = arith.mulf %63, %63 : f32
    %70 = arith.subf %68, %69 : f32
    %cst_33 = arith.constant 0.000000e+00 : f32
    %71 = arith.maximumf %70, %cst_33 : f32
    %cst_34 = arith.constant 9.99999974E-6 : f32
    %72 = arith.addf %71, %cst_34 : f32
    %73 = math.rsqrt %72 : f32
    %74 = vector.broadcast %73 : f32 to vector<1x8xf32>
    %75 = arith.mulf %74, %10 : vector<1x8xf32>
    %76 = vector.broadcast %63 : f32 to vector<1x1xf32>
    %77 = arith.addf %5, %76 : vector<1x1xf32>
    %78 = vector.broadcast %77 : vector<1x1xf32> to vector<1x8xf32>
    %79 = arith.mulf %78, %75 : vector<1x8xf32>
    %80 = arith.subf %11, %79 : vector<1x8xf32>
    %c0_35 = arith.constant 0 : index
    %c0_36 = arith.constant 0 : index
    %81 = vector.load %arg7[%c0_35, %c0_36] : memref<32x8xf32, #tpu.memory_space<vmem>>, vector<32x8xf32>
    %82 = vector.broadcast %75 : vector<1x8xf32> to vector<32x8xf32>
    %83 = arith.mulf %81, %82 : vector<32x8xf32>
    %84 = arith.truncf %83 : vector<32x8xf32> to vector<32x8xbf16>
    %85 = vector.broadcast %80 : vector<1x8xf32> to vector<32x8xf32>
    %86 = arith.mulf %81, %85 : vector<32x8xf32>
    %cst_37 = arith.constant dense<0.000000e+00> : vector<32xf32>
    %87 = vector.multi_reduction <add>, %86, %cst_37 [1] : vector<32x8xf32> to vector<32xf32>
    %88 = vector.shape_cast %87 : vector<32xf32> to vector<32x1xf32>
    %c0_38 = arith.constant 0 : index
    %c0_39 = arith.constant 0 : index
    %89 = vector.load %arg8[%c0_38, %c0_39] : memref<32x1xf32, #tpu.memory_space<vmem>>, vector<32x1xf32>
    %90 = arith.addf %88, %89 : vector<32x1xf32>
    %c0_40 = arith.constant 0 : index
    %c0_41 = arith.constant 0 : index
    %91 = vector.load %arg9[%c0_40, %c0_41] : memref<8x32xbf16, #tpu.memory_space<vmem>>, vector<8x32xbf16>
    %c0_i32_42 = arith.constant 0 : i32
    %c256_i32_43 = arith.constant 256 : i32
    %92 = arith.muli %c0_i32_42, %c256_i32_43 : i32
    %93 = tpu.assume_multiple %92, 128 : i32
    %c0_44 = arith.constant 0 : index
    %c0_45 = arith.constant 0 : index
    %94 = arith.index_cast %93 : i32 to index
    %95 = vector.load %arg10[%c0_44, %c0_45, %94] : memref<1x8x256xf32, #tpu.memory_space<vmem>>, vector<1x8x256xf32>
    %96 = vector.shape_cast %95 : vector<1x8x256xf32> to vector<8x256xf32>
    %97 = arith.truncf %96 : vector<8x256xf32> to vector<8x256xbf16>
    %cst_46 = arith.constant dense<0.000000e+00> : vector<32x256xf32>
    %98 = tpu.matmul %84, %97, %cst_46 {dimension_numbers = #tpu.dot_dimension_numbers<[1], [0], [0], [1], [0, 0, 1, 1], [], []>} : vector<32x8xbf16>, vector<8x256xbf16>, vector<32x256xf32> -> vector<32x256xf32>
    %99 = vector.broadcast %90 : vector<32x1xf32> to vector<32x256xf32>
    %100 = arith.addf %98, %99 : vector<32x256xf32>
    %cst_47 = arith.constant 0.000000e+00 : f32
    %101 = vector.broadcast %cst_47 : f32 to vector<32x256xf32>
    %102 = arith.cmpf ogt, %100, %101 : vector<32x256xf32>
    %cst_48 = arith.constant 0.00999999977 : f32
    %103 = vector.broadcast %cst_48 : f32 to vector<32x256xf32>
    %104 = arith.mulf %103, %100 : vector<32x256xf32>
    %105 = arith.select %102, %100, %104 : vector<32x256xi1>, vector<32x256xf32>
    %106 = arith.truncf %105 : vector<32x256xf32> to vector<32x256xbf16>
    %cst_49 = arith.constant dense<0.000000e+00> : vector<8x256xf32>
    %107 = tpu.matmul %91, %106, %cst_49 {dimension_numbers = #tpu.dot_dimension_numbers<[1], [0], [0], [1], [0, 0, 1, 1], [], []>} : vector<8x32xbf16>, vector<32x256xbf16>, vector<8x256xf32> -> vector<8x256xf32>
    %108 = vector.broadcast %8 : vector<8x1xf32> to vector<8x256xf32>
    %109 = arith.addf %107, %108 : vector<8x256xf32>
    %110 = vector.broadcast %9 : vector<8x1xf32> to vector<8x256xf32>
    %111 = arith.mulf %110, %109 : vector<8x256xf32>
    %112 = arith.addf %96, %111 : vector<8x256xf32>
    %c0_50 = arith.constant 0 : index
    %c0_51 = arith.constant 0 : index
    %113 = arith.index_cast %93 : i32 to index
    %114 = vector.load %arg10[%c0_50, %c0_51, %113] : memref<1x8x256xf32, #tpu.memory_space<vmem>>, vector<1x8x256xf32>
    %115 = vector.shape_cast %114 : vector<1x8x256xf32> to vector<8x256xf32>
    %116 = vector.shape_cast %112 : vector<8x256xf32> to vector<1x8x256xf32>
    tpu.vector_store %arg10[%c0_50, %c0_51, %113], %116 {strides = array<i32>} : memref<1x8x256xf32, #tpu.memory_space<vmem>>, vector<1x8x256xf32>,
    %c1_i32_52 = arith.constant 1 : i32
    return
  }
  func.func @transform_0(%arg0: i32) -> (i32, i32, i32) {
    %c0_i32 = arith.constant 0 : i32
    %c0_i32_0 = arith.constant 0 : i32
    %c0_i32_1 = arith.constant 0 : i32
    return %arg0, %c0_i32, %c0_i32_0 : i32, i32, i32
  }
  func.func @transform_1(%arg0: i32) -> (i32, i32, i32) {
    %c0_i32 = arith.constant 0 : i32
    %c0_i32_0 = arith.constant 0 : i32
    %c0_i32_1 = arith.constant 0 : i32
    return %arg0, %c0_i32, %c0_i32_0 : i32, i32, i32
  }
  func.func @transform_2(%arg0: i32) -> (i32, i32, i32) {
    %c0_i32 = arith.constant 0 : i32
    %c0_i32_0 = arith.constant 0 : i32
    %c0_i32_1 = arith.constant 0 : i32
    return %arg0, %c0_i32, %c0_i32_0 : i32, i32, i32
  }
  func.func @transform_3(%arg0: i32) -> (i32, i32) {
    %c0_i32 = arith.constant 0 : i32
    %c0_i32_0 = arith.constant 0 : i32
    %c0_i32_1 = arith.constant 0 : i32
    return %c0_i32, %c0_i32_0 : i32, i32
  }
  func.func @transform_4(%arg0: i32) -> (i32, i32) {
    %c0_i32 = arith.constant 0 : i32
    %c0_i32_0 = arith.constant 0 : i32
    %c0_i32_1 = arith.constant 0 : i32
    return %c0_i32, %c0_i32_0 : i32, i32
  }
  func.func @transform_5(%arg0: i32) -> (i32, i32) {
    %c0_i32 = arith.constant 0 : i32
    %c0_i32_0 = arith.constant 0 : i32
    %c0_i32_1 = arith.constant 0 : i32
    return %c0_i32, %c0_i32_0 : i32, i32
  }
  func.func @transform_6(%arg0: i32) -> (i32, i32) {
    %c0_i32 = arith.constant 0 : i32
    %c0_i32_0 = arith.constant 0 : i32
    %c0_i32_1 = arith.constant 0 : i32
    return %c0_i32, %c0_i32_0 : i32, i32
  }
  func.func @transform_7(%arg0: i32) -> (i32, i32) {
    %c0_i32 = arith.constant 0 : i32
    %c0_i32_0 = arith.constant 0 : i32
    %c0_i32_1 = arith.constant 0 : i32
    return %c0_i32, %c0_i32_0 : i32, i32
  }
  func.func @transform_8(%arg0: i32) -> (i32, i32) {
    %c0_i32 = arith.constant 0 : i32
    %c0_i32_0 = arith.constant 0 : i32
    %c0_i32_1 = arith.constant 0 : i32
    return %c0_i32, %c0_i32_0 : i32, i32
  }
  func.func @transform_9(%arg0: i32) -> (i32, i32, i32) {
    %c0_i32 = arith.constant 0 : i32
    %c0_i32_0 = arith.constant 0 : i32
    %c0_i32_1 = arith.constant 0 : i32
    return %arg0, %c0_i32, %c0_i32_0 : i32, i32, i32
  }
}

</mosaic_0001>

<bundles_post_ra>
// kernel: noformer_block.2
= control target key start
LH: loop header
LB: loop body
LE: loop exit
PB: predicated region body
PF: predicated region fallthrough
CT: control target
= control target key end

     0   :  { %s321_s12 = smov 0   ;;  %s352_s0 = inlined_call_operand.vmem [shape: f32[2,8,256], index: 0, kind: input, shape index: {}]   ;;  %s353_s1 = inlined_call_operand.vmem [shape: f32[1,8], index: 1, kind: input, shape index: {}]   ;;  %s354_s2 = inlined_call_operand.vmem [shape: f32[1,8], index: 2, kind: input, shape index: {}]   ;;  %s355_s3 = inlined_call_operand.vmem [shape: f32[2,3,8], index: 3, kind: output, shape index: {}]  }
   0x1 LB: > { %s266_s13 = sadd.s32 4294967295, %s299_s12   ;;  %p270_p0 = scmp.ge.s32.totalorder %s299_s12, 1  ;;  %s299_s12 = sphi %s321_s12, %s13_s12  }
   0x2   : > { %p137_p1 = scmp.lt.s32.totalorder %s299_s12, 3 }
   0x4   : > { %p138_p2 = pnand %p270_p0, %p137_p1 }
   0x5   : > { %p160_p3 = scmp.lt.s32.totalorder (!%p138_p2), %s266_s13, 1  ;;  %vm208_vm0 = vcmask (!%p138_p2), 57344   ;;  %v202_v25 = vld [vmem:[%s353_s1] sm:$0x1] (!%p138_p2) }
   0x6   : > { %141 = sbr.rel (%p138_p2) target bundleno = 510 (0x1fe), region = 32  ;;  %v205_v28 = vld [vmem:[%s354_s2] sm:$0x1] (!%p138_p2) }
   0xd   : > { %s357_s13 = smov (!%p160_p3, %s266_s13), 1 }
   0xe   : > { %s276_s14 = sshll.u32 %s357_s13, 4  ;;  %s273_s18 = sshll.u32 %s357_s13, 2 }
   0xf   : > { %s164_s17 = scalar_lea.vmem %s352_s0, %s276_s14  ;;  %s335_s22 = scalar_lea.vmem %s355_s3, %s273_s18 }
  0x10   : > { %v169_v0 = vld [vmem:[%s164_s17] sm:$0xff]  ;;  %v170_v1 = vld [vmem:[%s164_s17 + $0x8] sm:$0xff] }
  0x11   : > { %v171_v2 = vadd.f32 %v170_v1, %v169_v0 }
  0x13   : > { %172 = vadd.xlane.f32.xlu0 %v171_v2 }
  0xa0   : > { %v173_v3 = vpop.xlane.xlu0 %172 }
  0xa1   : > { %v174_v4 = vrot.slane %v173_v3, 4 }
  0xa3   : > { %v175_v5 = vadd.f32 %v174_v4, %v173_v3 }
  0xa5   : > { %v176_v6 = vrot.slane %v175_v5, 2 }
  0xa7   : > { %v177_v7 = vadd.f32 %v176_v6, %v175_v5 }
  0xa9   : > { %v178_v8 = vrot.slane %v177_v7, 1 }
  0xab   : > { %v179_v9 = vadd.f32 %v178_v8, %v177_v7 }
  0xad   : > { %277 = vpush %v179_v9 }
  0xde   : > { %s278_s19 = spop %277 }
  0xdf   : > { %s181_s23 = smul.f32 0.00048828125, %s278_s19 }
  0xe1   : > { %v182_v10 = vstv %s181_s23 }
  0xe2   : > { %212 = vst.msk [vmem:[%s335_s22 + $0x2] sm:$0x1] %vm208_vm0, %v182_v10  ;;  %v183_v11 = vsub.f32 %v169_v0, %v182_v10  ;;  %v184_v12 = vsub.f32 %v170_v1, %v182_v10 }
  0xe4   : > { %v185_v13 = vmul.f32 %v183_v11, %v183_v11  ;;  %v186_v14 = vmul.f32 %v184_v12, %v184_v12 }
  0xe6   : > { %v187_v15 = vadd.f32 %v186_v14, %v185_v13 }
  0xe8   : > { %188 = vadd.xlane.f32.xlu0 %v187_v15 }
 0x175   : > { %v189_v16 = vpop.xlane.xlu0 %188 }
 0x176   : > { %v190_v17 = vrot.slane %v189_v16, 4 }
 0x178   : > { %v191_v18 = vadd.f32 %v190_v17, %v189_v16 }
 0x17a   : > { %v192_v19 = vrot.slane %v191_v18, 2 }
 0x17c   : > { %v193_v20 = vadd.f32 %v192_v19, %v191_v18 }
 0x17e   : > { %v194_v21 = vrot.slane %v193_v20, 1 }
 0x180   : > { %v195_v22 = vadd.f32 %v194_v21, %v193_v20 }
 0x182   : > { %279 = vpush %v195_v22 }
 0x1b3   : > { %s280_s24 = spop %279 }
 0x1b4   : > { %s197_s25 = smul.f32 0.00048828125, %s280_s24 }
 0x1b6   : > { %s198_s26 = sadd.f32 1e-05, %s197_s25 }
 0x1b8   : > { %v199_v23 = vstv %s198_s26 }
 0x1b9   : > { %291 = vrsqrt.f32 %v199_v23 }
 0x1c3   : > { %v292_v24 = vpop.eup %291 }
 0x1c4   : > { %281 = vpush %v292_v24 }
 0x1f5   : > { %s282_s29 = spop %281 }
 0x1f6   : > { %v203_v26 = vstv %s282_s29 }
 0x1f7   : > { %v204_v27 = vmul.f32 %v203_v26, %v202_v25 }
 0x1f9   : > { %v206_v29 = vmul.f32 %v204_v27, %v182_v10  ;;  %209 = vst.msk [vmem:[%s335_s22] sm:$0x1] %vm208_vm0, %v204_v27 }
 0x1fb   : > { %v207_v30 = vsub.f32 %v205_v28, %v206_v29 }
 0x1fd   : > { %210 = vst.msk [vmem:[%s335_s22 + $0x1] sm:$0x1] %vm208_vm0, %v207_v30 }
 0x1fe PF: > { %s13_s12 = sadd.s32 1, %s299_s12  }
 0x1ff   : > { %p10_p4 = scmp.ge.s32.totalorder %s13_s12, 4  }
 0x201   :  { %12 = sbr.rel (!%p10_p4) target bundleno = 1 (0x1), region = 62 }

// kernel: reverse.0
= control target key start
LH: loop header
LB: loop body
LE: loop exit
PB: predicated region body
PF: predicated region fallthrough
CT: control target
= control target key end

     0   :  { %v103_v3 = vlaneseq  ;;  %v96_v18 = vld [vmem:[#allocation0 + $0x7] ss:$-1 sm:$0xff]  ;;  %v110_v19 = vld [vmem:[#allocation0 + $0x17] ss:$-1 sm:$0xff]  ;;  %s604_s0 = inlined_call_operand.vmem [shape: f32[2,8,16,7], index: 0, kind: input, shape index: {}]   ;;  %s605_s1 = inlined_call_operand.vmem [shape: f32[2,8,16,7], index: 1, kind: output, shape index: {}]  }
   0x1   :  { %v60_v0 = vld [vmem:[%s604_s0] sm:$0xff]  ;;  %v62_v1 = vld [vmem:[%s604_s0 + $0x8] sm:$0xff]  ;;  %v64_v2 = vld [vmem:[%s604_s0 + $0x10] sm:$0xff]  ;;  %v97_v20 = vrot.slane %v96_v18, 1  ;;  %v111_v21 = vrot.slane %v110_v19, 1 }
   0x2   :  { %61 = vst [vmem:[#allocation0 + $0x8] sm:$0xff] %v60_v0  ;;  %63 = vst [vmem:[#allocation0 + $0x18] sm:$0xff] %v62_v1  ;;  %v66_v4 = vld [vmem:[%s604_s0 + $0x18] sm:$0xff]  ;;  %v68_v5 = vld [vmem:[%s604_s0 + $0x20] sm:$0xff]  ;;  %v500_v10 = vshrl.u32 %v103_v3, 7 }
   0x3   :  { %65 = vst [vmem:[#allocation0 + $0x28] sm:$0xff] %v64_v2  ;;  %v70_v6 = vld [vmem:[%s604_s0 + $0x28] sm:$0xff]  ;;  %67 = vst [vmem:[#allocation0 + $0x38] sm:$0xff] %v66_v4  ;;  %v72_v7 = vld [vmem:[%s604_s0 + $0x30] sm:$0xff] }
   0x4   :  { %69 = vst [vmem:[#allocation0 + $0x48] sm:$0xff] %v68_v5  ;;  %71 = vst [vmem:[#allocation0 + $0x58] sm:$0xff] %v70_v6  ;;  %v74_v8 = vld [vmem:[%s604_s0 + $0x38] sm:$0xff]  ;;  %v76_v9 = vld [vmem:[%s604_s0 + $0x40] sm:$0xff]  ;;  %vm105_vm0 = vcmp.lt.s32.totalorder %v500_v10, 7 }
   0x5   :  { %73 = vst [vmem:[#allocation0 + $0x68] sm:$0xff] %v72_v7  ;;  %75 = vst [vmem:[#allocation0 + $0x78] sm:$0xff] %v74_v8  ;;  %v78_v11 = vld [vmem:[%s604_s0 + $0x48] sm:$0xff]  ;;  %v80_v12 = vld [vmem:[%s604_s0 + $0x50] sm:$0xff] }
   0x6   :  { %77 = vst [vmem:[#allocation0 + $0x88] sm:$0xff] %v76_v9  ;;  %v82_v13 = vld [vmem:[%s604_s0 + $0x58] sm:$0xff]  ;;  %79 = vst [vmem:[#allocation0 + $0x98] sm:$0xff] %v78_v11  ;;  %v84_v14 = vld [vmem:[%s604_s0 + $0x60] sm:$0xff] }
   0x7   :  { %81 = vst [vmem:[#allocation0 + $0xa8] sm:$0xff] %v80_v12  ;;  %83 = vst [vmem:[#allocation0 + $0xb8] sm:$0xff] %v82_v13  ;;  %v86_v15 = vld [vmem:[%s604_s0 + $0x68] sm:$0xff]  ;;  %v88_v16 = vld [vmem:[%s604_s0 + $0x70] sm:$0xff] }
   0x8   :  { %85 = vst [vmem:[#allocation0 + $0xc8] sm:$0xff] %v84_v14  ;;  %87 = vst [vmem:[#allocation0 + $0xd8] sm:$0xff] %v86_v15  ;;  %v90_v17 = vld [vmem:[%s604_s0 + $0x78] sm:$0xff]  ;;  %v124_v22 = vld [vmem:[#allocation0 + $0x27] ss:$-1 sm:$0xff] }
   0x9   :  { %89 = vst [vmem:[#allocation0 + $0xe8] sm:$0xff] %v88_v16  ;;  %91 = vst [vmem:[#allocation0 + $0xf8] sm:$0xff] %v90_v17  ;;  %v138_v23 = vld [vmem:[#allocation0 + $0x37] ss:$-1 sm:$0xff]  ;;  %v125_v24 = vrot.slane %v124_v22, 1 }
   0xa   :  { %v139_v25 = vrot.slane %v138_v23, 1  ;;  %v152_v26 = vld [vmem:[#allocation0 + $0x47] ss:$-1 sm:$0xff]  ;;  %v166_v27 = vld [vmem:[#allocation0 + $0x57] ss:$-1 sm:$0xff]  ;;  %98 = vst [vmem:[#allocation1] sm:$0xff] %v97_v20 }
   0xb   :  { %v101_v28 = vld [vmem:[#allocation0 + $0xf] ss:$-1 sm:$0xff]  ;;  %112 = vst [vmem:[#allocation1 + $0x8] sm:$0xff] %v111_v21  ;;  %v115_v29 = vld [vmem:[#allocation0 + $0x1f] ss:$-1 sm:$0xff]  ;;  %126 = vst [vmem:[#allocation1 + $0x10] sm:$0xff] %v125_v24 }
   0xc   :  { %v129_v30 = vld [vmem:[#allocation0 + $0x2f] ss:$-1 sm:$0xff]  ;;  %v102_v31 = vrot.slane %v101_v28, 1  ;;  %v116_v32 = vrot.slane %v115_v29, 1  ;;  %140 = vst [vmem:[#allocation1 + $0x18] sm:$0xff] %v139_v25  ;;  %v153_v35 = vrot.slane %v152_v26, 1 }
   0xd   :  { %v130_v33 = vrot.slane %v129_v30, 1  ;;  %v143_v34 = vld [vmem:[#allocation0 + $0x3f] ss:$-1 sm:$0xff]  ;;  %v157_v37 = vld [vmem:[#allocation0 + $0x4f] ss:$-1 sm:$0xff]  ;;  %v167_v38 = vrot.slane %v166_v27, 1 }
   0xe   :  { %v144_v36 = vrot.slane %v143_v34, 1  ;;  %v171_v39 = vld [vmem:[#allocation0 + $0x5f] ss:$-1 sm:$0xff]  ;;  %106 = vst.msk [vmem:[#allocation1] sm:$0xff] %vm105_vm0, %v102_v31  ;;  %120 = vst.msk [vmem:[#allocation1 + $0x8] sm:$0xff] %vm105_vm0, %v116_v32  ;;  %v158_v40 = vrot.slane %v157_v37, 1 }
   0xf   :  { %134 = vst.msk [vmem:[#allocation1 + $0x10] sm:$0xff] %vm105_vm0, %v130_v33  ;;  %154 = vst [vmem:[#allocation1 + $0x20] sm:$0xff] %v153_v35  ;;  %v172_v41 = vrot.slane %v171_v39, 1  ;;  %v180_v42 = vld [vmem:[#allocation0 + $0x67] ss:$-1 sm:$0xff] }
  0x10   :  { %v185_v43 = vld [vmem:[#allocation0 + $0x6f] ss:$-1 sm:$0xff]  ;;  %148 = vst.msk [vmem:[#allocation1 + $0x18] sm:$0xff] %vm105_vm0, %v144_v36  ;;  %168 = vst [vmem:[#allocation1 + $0x28] sm:$0xff] %v167_v38  ;;  %v181_v44 = vrot.slane %v180_v42, 1 }
  0x11   :  { %v186_v45 = vrot.slane %v185_v43, 1  ;;  %v194_v46 = vld [vmem:[#allocation0 + $0x77] ss:$-1 sm:$0xff]  ;;  %v199_v47 = vld [vmem:[#allocation0 + $0x7f] ss:$-1 sm:$0xff]  ;;  %162 = vst.msk [vmem:[#allocation1 + $0x20] sm:$0xff] %vm105_vm0, %v158_v40 }
  0x12   :  { %176 = vst.msk [vmem:[#allocation1 + $0x28] sm:$0xff] %vm105_vm0, %v172_v41  ;;  %v195_v48 = vrot.slane %v194_v46, 1  ;;  %v200_v49 = vrot.slane %v199_v47, 1  ;;  %v208_v50 = vld [vmem:[#allocation0 + $0x87] ss:$-1 sm:$0xff]  ;;  %182 = vst [vmem:[#allocation1 + $0x30] sm:$0xff] %v181_v44 }
  0x13   :  { %v213_v51 = vld [vmem:[#allocation0 + $0x8f] ss:$-1 sm:$0xff]  ;;  %v209_v52 = vrot.slane %v208_v50, 1  ;;  %v222_v54 = vld [vmem:[#allocation0 + $0x97] ss:$-1 sm:$0xff]  ;;  %190 = vst.msk [vmem:[#allocation1 + $0x30] sm:$0xff] %vm105_vm0, %v186_v45 }
  0x14   :  { %v214_v53 = vrot.slane %v213_v51, 1  ;;  %v227_v55 = vld [vmem:[#allocation0 + $0x9f] ss:$-1 sm:$0xff]  ;;  %196 = vst [vmem:[#allocation1 + $0x38] sm:$0xff] %v195_v48  ;;  %v223_v56 = vrot.slane %v222_v54, 1 }
  0x15   :  { %v228_v57 = vrot.slane %v227_v55, 1  ;;  %v236_v58 = vld [vmem:[#allocation0 + $0xa7] ss:$-1 sm:$0xff]  ;;  %v241_v59 = vld [vmem:[#allocation0 + $0xaf] ss:$-1 sm:$0xff]  ;;  %204 = vst.msk [vmem:[#allocation1 + $0x38] sm:$0xff] %vm105_vm0, %v200_v49 }
  0x16   :  { %210 = vst [vmem:[#allocation1 + $0x40] sm:$0xff] %v209_v52  ;;  %v237_v60 = vrot.slane %v236_v58, 1  ;;  %v242_v61 = vrot.slane %v241_v59, 1  ;;  %v250_v62 = vld [vmem:[#allocation0 + $0xb7] ss:$-1 sm:$0xff]  ;;  %224 = vst [vmem:[#allocation1 + $0x48] sm:$0xff] %v223_v56 }
  0x17   :  { %v255_v63 = vld [vmem:[#allocation0 + $0xbf] ss:$-1 sm:$0xff]  ;;  %218 = vst.msk [vmem:[#allocation1 + $0x40] sm:$0xff] %vm105_vm0, %v214_v53  ;;  %v251_v0 = vrot.slane %v250_v62, 1  ;;  %v264_v2 = vld [vmem:[#allocation0 + $0xc7] ss:$-1 sm:$0xff] }
  0x18   :  { %v256_v1 = vrot.slane %v255_v63, 1  ;;  %v269_v3 = vld [vmem:[#allocation0 + $0xcf] ss:$-1 sm:$0xff]  ;;  %232 = vst.msk [vmem:[#allocation1 + $0x48] sm:$0xff] %vm105_vm0, %v228_v57  ;;  %238 = vst [vmem:[#allocation1 + $0x50] sm:$0xff] %v237_v60  ;;  %v265_v4 = vrot.slane %v264_v2, 1 }
  0x19   :  { %v270_v5 = vrot.slane %v269_v3, 1  ;;  %v278_v6 = vld [vmem:[#allocation0 + $0xd7] ss:$-1 sm:$0xff]  ;;  %v283_v7 = vld [vmem:[#allocation0 + $0xdf] ss:$-1 sm:$0xff]  ;;  %246 = vst.msk [vmem:[#allocation1 + $0x50] sm:$0xff] %vm105_vm0, %v242_v61 }
  0x1a   :  { %252 = vst [vmem:[#allocation1 + $0x58] sm:$0xff] %v251_v0  ;;  %v279_v8 = vrot.slane %v278_v6, 1  ;;  %v284_v9 = vrot.slane %v283_v7, 1  ;;  %v292_v11 = vld [vmem:[#allocation0 + $0xe7] ss:$-1 sm:$0xff]  ;;  %266 = vst [vmem:[#allocation1 + $0x60] sm:$0xff] %v265_v4 }
  0x1b   :  { %v297_v12 = vld [vmem:[#allocation0 + $0xef] ss:$-1 sm:$0xff]  ;;  %260 = vst.msk [vmem:[#allocation1 + $0x58] sm:$0xff] %vm105_vm0, %v256_v1  ;;  %v293_v13 = vrot.slane %v292_v11, 1  ;;  %v306_v15 = vld [vmem:[#allocation0 + $0xf7] ss:$-1 sm:$0xff] }
  0x1c   :  { %v298_v14 = vrot.slane %v297_v12, 1  ;;  %v311_v16 = vld [vmem:[#allocation0 + $0xff] ss:$-1 sm:$0xff]  ;;  %274 = vst.msk [vmem:[#allocation1 + $0x60] sm:$0xff] %vm105_vm0, %v270_v5  ;;  %280 = vst [vmem:[#allocation1 + $0x68] sm:$0xff] %v279_v8  ;;  %v307_v17 = vrot.slane %v306_v15, 1 }
  0x1d   :  { %v312_v18 = vrot.slane %v311_v16, 1  ;;  %v374_v19 = vld [vmem:[#allocation1] sm:$0xff]  ;;  %v376_v20 = vld [vmem:[#allocation1 + $0x8] sm:$0xff]  ;;  %v378_v21 = vld [vmem:[#allocation1 + $0x10] sm:$0xff]  ;;  %288 = vst.msk [vmem:[#allocation1 + $0x68] sm:$0xff] %vm105_vm0, %v284_v9 }
  0x1e   :  { %294 = vst [vmem:[#allocation1 + $0x70] sm:$0xff] %v293_v13  ;;  %375 = vst [vmem:[%s605_s1] sm:$0xff] %v374_v19  ;;  %v380_v22 = vld [vmem:[#allocation1 + $0x18] sm:$0xff]  ;;  %v382_v23 = vld [vmem:[#allocation1 + $0x20] sm:$0xff] }
  0x1f   :  { %377 = vst [vmem:[%s605_s1 + $0x8] sm:$0xff] %v376_v20  ;;  %379 = vst [vmem:[%s605_s1 + $0x10] sm:$0xff] %v378_v21  ;;  %v384_v24 = vld [vmem:[#allocation1 + $0x28] sm:$0xff]  ;;  %v386_v25 = vld [vmem:[#allocation1 + $0x30] sm:$0xff] }
  0x20   :  { %302 = vst.msk [vmem:[#allocation1 + $0x70] sm:$0xff] %vm105_vm0, %v298_v14  ;;  %308 = vst [vmem:[#allocation1 + $0x78] sm:$0xff] %v307_v17  ;;  %v388_v26 = vld [vmem:[#allocation1 + $0x38] sm:$0xff]  ;;  %v390_v10 = vld [vmem:[#allocation1 + $0x40] sm:$0xff] }
  0x21   :  { %381 = vst [vmem:[%s605_s1 + $0x18] sm:$0xff] %v380_v22  ;;  %383 = vst [vmem:[%s605_s1 + $0x20] sm:$0xff] %v382_v23  ;;  %v392_v27 = vld [vmem:[#allocation1 + $0x48] sm:$0xff]  ;;  %v394_v28 = vld [vmem:[#allocation1 + $0x50] sm:$0xff] }
  0x22   :  { %385 = vst [vmem:[%s605_s1 + $0x28] sm:$0xff] %v384_v24  ;;  %316 = vst.msk [vmem:[#allocation1 + $0x78] sm:$0xff] %vm105_vm0, %v312_v18  ;;  %v396_v29 = vld [vmem:[#allocation1 + $0x58] sm:$0xff] }
  0x23   :  { %387 = vst [vmem:[%s605_s1 + $0x30] sm:$0xff] %v386_v25  ;;  %389 = vst [vmem:[%s605_s1 + $0x38] sm:$0xff] %v388_v26  ;;  %v398_v30 = vld [vmem:[#allocation1 + $0x60] sm:$0xff] }
  0x24   :  { %391 = vst [vmem:[%s605_s1 + $0x40] sm:$0xff] %v390_v10  ;;  %393 = vst [vmem:[%s605_s1 + $0x48] sm:$0xff] %v392_v27  ;;  %v400_v31 = vld [vmem:[#allocation1 + $0x68] sm:$0xff] }
  0x25   :  { %395 = vst [vmem:[%s605_s1 + $0x50] sm:$0xff] %v394_v28  ;;  %397 = vst [vmem:[%s605_s1 + $0x58] sm:$0xff] %v396_v29 }
  0x26   :  { %399 = vst [vmem:[%s605_s1 + $0x60] sm:$0xff] %v398_v30  ;;  %401 = vst [vmem:[%s605_s1 + $0x68] sm:$0xff] %v400_v31 }
  0x27   :  { %v402_v32 = vld [vmem:[#allocation1 + $0x70] sm:$0xff] }
  0x28   :  { %403 = vst [vmem:[%s605_s1 + $0x70] sm:$0xff] %v402_v32 }
  0x29   :  { %v404_v33 = vld [vmem:[#allocation1 + $0x78] sm:$0xff] }
  0x2a   :  { %405 = vst [vmem:[%s605_s1 + $0x78] sm:$0xff] %v404_v33 }

// kernel: noformer_block.3
= control target key start
LH: loop header
LB: loop body
LE: loop exit
PB: predicated region body
PF: predicated region fallthrough
CT: control target
= control target key end

     0   :  { %s940_s30 = smov 0   ;;  %s1051_s0 = inlined_call_operand.vmem [shape: f32[2,8,256], index: 0, kind: input, shape index: {}, may-alias: {0,9}]   ;;  %s1052_s1 = inlined_call_operand.vmem [shape: bf16[2,8,256], index: 1, kind: input, shape index: {}]   ;;  %s1053_s2 = inlined_call_operand.vmem [shape: f32[2,3,8], index: 2, kind: input, shape index: {}]   ;;  %s1054_s3 = inlined_call_operand.vmem [shape: f32[8,4], index: 3, kind: input, shape index: {}]   ;;  %s1055_s4 = inlined_call_operand.vmem [shape: f32[2,8], index: 4, kind: input, shape index: {}]   ;;  %s1056_s5 = inlined_call_operand.vmem [shape: f32[8,8], index: 5, kind: input, shape index: {}]   ;;  %s1057_s6 = inlined_call_operand.vmem [shape: f32[32,8], index: 6, kind: input, shape index: {}]   ;;  %s1058_s7 = inlined_call_operand.vmem [shape: f32[32,1], index: 7, kind: input, shape index: {}]   ;;  %s1059_s8 = inlined_call_operand.vmem [shape: bf16[8,32], index: 8, kind: input, shape index: {}]   ;;  %s1060_s9 = inlined_call_operand.vmem [shape: f32[2,8,256], index: 9, kind: output, shape index: {}, may-alias: {0,9}]  }
   0x1 LB: > { %s824_s10 = sadd.s32 4294967295, %s883_s30   ;;  %p828_p0 = scmp.ge.s32.totalorder %s883_s30, 1  ;;  %s883_s30 = sphi %s940_s30, %s19_s30  }
   0x2   : > { %p306_p1 = scmp.lt.s32.totalorder %s883_s30, 3 }
   0x4   : > { %p307_p2 = pnand %p828_p0, %p306_p1 }
   0x5   : > { %p351_p3 = scmp.lt.s32.totalorder (!%p307_p2), %s824_s10, 1  ;;  %v885_v0 = vmov (!%p307_p2), 0   ;;  %v377_v1 = vld [vmem:[%s1056_s5] sm:$0xff] (!%p307_p2)  ;;  %vm389_vm0 = vcmask (!%p307_p2), 64512   ;;  %vm409_vm1 = vcmask (!%p307_p2), 1043456   ;;  %v886_v15 = vmov (!%p307_p2), 1  }
   0x6   : > { %310 = sbr.rel (%p307_p2) target bundleno = 1164 (0x48c), region = 56  ;;  %448 = vmatprep.mubr.bf16.mxu0 (!%p307_p2), %v885_v0  ;;  %870 = vset.pattern.permute.xlu0 (!%p307_p2), %v885_v0  ;;  %v976_v14 = vld [vmem:[%s1054_s3] sm:$0xff] (!%p307_p2)  ;;  %s887_s16 = smov (!%p307_p2), 0.0   ;;  %vm690_vm12 = vcmask (!%p307_p2), 261120  }
   0x7   : > { %637 = vmatprep.mubr.bf16.mxu1 (!%p307_p2), %v885_v0  ;;  %871 = vset.pattern.permute.xlu1 (!%p307_p2), %v886_v15 }
   0x8   : > { %467 = vperm.xlu1 (!%p307_p2), %871, %v976_v14  }
   0xc   : > { %872 = vset.pattern.permute.xlu1 (!%p307_p2), %v885_v0 }
   0xd   : > { %s1062_s10 = smov (!%p351_p3, %s824_s10), 1 }
   0xe   : > { %s833_s11 = sshll.u32 %s1062_s10, 2  ;;  %s846_s14 = sshll.u32 %s1062_s10, 4 }
   0xf   : > { %s364_s17 = scalar_lea.vmem %s1053_s2, %s833_s11  ;;  %s355_s20 = scalar_lea.vmem %s1051_s0, %s846_s14 }
  0x10   : > { %v837_v2 = vld [vmem:[%s364_s17 + $0x1] ss:$0 sm:$0xff]  ;;  %v836_v3 = vld [vmem:[%s364_s17] ss:$0 sm:$0xff]  ;;  %v395_v4 = vld [vmem:[%s355_s20 + $0x8] sm:$0xff]  ;;  %s847_s23 = sshll.u32 %s1062_s10, 3 }
  0x11   : > { %v388_v5 = vmul.f32 %v837_v2, %v377_v1  ;;  %v382_v6 = vmul.f32 %v836_v3, %v377_v1  ;;  %v400_v7 = vpack.c.bf16 %v395_v4, %v395_v4  ;;  %v394_v8 = vld [vmem:[%s355_s20] sm:$0xff]  ;;  %s360_s26 = scalar_lea.vmem %s1052_s1, %s847_s23 }
  0x12   : > { %v399_v9 = vpack.c.bf16 %v394_v8, %v394_v8  ;;  %v971_v13 = vld [vmem:[%s364_s17 + $0x2] sm:$0x1] }
  0x13   : > { %v390_v10 = vsel %vm389_vm0, %v388_v5, 0.0  ;;  %838 = vmatprep.subr.msk.bf16.mxu0 %vm409_vm1, %v400_v7  ;;  %v383_v11 = vpack.c.bf16 %v382_v6, %v382_v6  ;;  %849 = vpush %v971_v13  ;;  %v396_v22 = vld [vmem:[%s360_s26] sm:$0xff]  ;;  %s369_s26 = scalar_lea.vmem %s1060_s9, %s846_s14 }
  0x14   : > { %391 = vadd.xlane.f32.xlu0 %v390_v10  ;;  %v411_v12 = vsel %vm409_vm1, %v399_v9, 0  ;;  %v397_v23 = vunpack.c.l.bf16 %v396_v22  ;;  %v398_v24 = vunpack.c.h.bf16 %v396_v22  ;;  %v375_v6 = vld [vmem:[%s1055_s4] sm:$0x1]  ;;  %v376_v22 = vld [vmem:[%s1055_s4 + $0x1] sm:$0x1] }
  0x15   : > { %417 = vmatpush1.bf16.msra.mxu0 %v411_v12  ;;  %v526_v10 = vld [vmem:[%s1057_s6] sm:$0xff] }
  0x18   : > { %839 = vmatmul.mubr.msk.bf16.vlgmr.msra.gmra.mrb[0].mxu0 %vm389_vm0, %v383_v11  ;;  %v527_v11 = vld [vmem:[%s1057_s6 + $0x8] sm:$0xff] }
  0x19   : > { %726 = vmatprep.mubr.bf16.mxu0 %v885_v0 }
  0x44   : > { %s850_s27 = spop %849 }
  0x45   : > { %v478_v37 = vstv %s850_s27 }
  0x87   : > { %v468_v30 = vpop.permute.xlu1 %467 }
  0xa1   : > { %v392_v16 = vpop.xlane.xlu0 %391 }
  0xa2   : > { %v393_v17 = vadd.f32 %v392_v16, %v976_v14 }
  0xa4   : > { %403 = vperm.xlu0 %870, %v393_v17   ;;  %v528_v17 = vld [vmem:[%s1057_s6 + $0x10] sm:$0xff] }
  0xeb   : > { %v450_v18 = vpop.f32.mrb[0].mxu0 }
  0xec   : > { %v452_v19 = vpop.f32.mrb[1].mxu0 }
  0xed   : > { %v454_v20 = vpop.f32.mrb[2].mxu0 }
  0xee   : > { %v455_v21 = vpop.f32.mrb[3].mxu0 }
 0x123   : > { %v404_v25 = vpop.permute.xlu0 %403 }
 0x124   : > { %v451_v26 = vadd.f32 %v450_v18, %v404_v25  ;;  %v453_v27 = vadd.f32 %v452_v19, %v404_v25  ;;  %v529_v18 = vld [vmem:[%s1057_s6 + $0x18] sm:$0xff] }
 0x126   : > { %v457_v28 = vadd.f32 %v451_v26, %v397_v23  ;;  %v458_v29 = vadd.f32 %v453_v27, %v398_v24 }
 0x128   : > { %vm459_vm2 = vcmp.gt.f32.partialorder %v457_v28, 0.0  ;;  %vm460_vm3 = vcmp.gt.f32.partialorder %v458_v29, 0.0  ;;  %v461_v31 = vmul.f32 0.01, %v457_v28  ;;  %v462_v32 = vmul.f32 0.01, %v458_v29 }
 0x12a   : > { %v463_v33 = vsel %vm459_vm2, %v457_v28, %v461_v31  ;;  %v464_v34 = vsel %vm460_vm3, %v458_v29, %v462_v32 }
 0x12b   : > { %v470_v35 = vmul.f32 %v468_v30, %v463_v33  ;;  %v471_v36 = vmul.f32 %v468_v30, %v464_v34  ;;  %v561_v34 = vld [vmem:[%s1058_s7 + $0x8] sm:$0xff] }
 0x12d   : > { %v986_v38 = vadd.f32 %v470_v35, %v394_v8  ;;  %v988_v39 = vadd.f32 %v471_v36, %v395_v4  ;;  %v530_v4 = vlaneseq  ;;  %v560_v35 = vld [vmem:[%s1058_s7] sm:$0xff] }
 0x12f   : > { %v480_v40 = vsub.f32 %v986_v38, %v478_v37  ;;  %v481_v41 = vsub.f32 %v988_v39, %v478_v37  ;;  %v572_v42 = vpack.c.bf16 %v988_v39, %v988_v39  ;;  %v571_v43 = vpack.c.bf16 %v986_v38, %v986_v38 }
 0x130   : > { %v531_v5 = vshrl.u32 %v530_v4, 7 }
 0x131   : > { %v486_v44 = vadd.f32 %v481_v41, %v480_v40  ;;  %v482_v45 = vmul.f32 %v480_v40, %v480_v40  ;;  %v483_v46 = vmul.f32 %v481_v41, %v481_v41  ;;  %840 = vmatprep.subr.msk.bf16.mxu1 %vm409_vm1, %v572_v42  ;;  %v600_v47 = vsel %vm409_vm1, %v571_v43, 0  ;;  %v562_v42 = vld [vmem:[%s1058_s7 + $0x10] sm:$0xff] }
 0x132   : > { %606 = vmatpush1.bf16.msra.mxu1 %v600_v47  ;;  %v532_v7 = vsub.s32 0, %v531_v5 }
 0x133   : > { %488 = vadd.xlane.f32.xlu1 %v486_v44  ;;  %v487_v48 = vadd.f32 %v483_v46, %v482_v45  ;;  %v563_v45 = vld [vmem:[%s1058_s7 + $0x18] sm:$0xff] }
 0x137   : > { %498 = vadd.xlane.f32.xlu1 %v487_v48 }
 0x1c0   : > { %v489_v49 = vpop.xlane.xlu1 %488 }
 0x1c1   : > { %v490_v50 = vrot.slane %v489_v49, 4 }
 0x1c3   : > { %v491_v51 = vadd.f32 %v490_v50, %v489_v49 }
 0x1c4   : > { %v499_v52 = vpop.xlane.xlu1 %498 }
 0x1c5   : > { %v492_v53 = vrot.slane %v491_v51, 2  ;;  %v500_v54 = vrot.slane %v499_v52, 4 }
 0x1c7   : > { %v501_v55 = vadd.f32 %v500_v54, %v499_v52  ;;  %v493_v56 = vadd.f32 %v492_v53, %v491_v51 }
 0x1c9   : > { %v502_v57 = vrot.slane %v501_v55, 2  ;;  %v494_v58 = vrot.slane %v493_v56, 1 }
 0x1cb   : > { %v495_v59 = vadd.f32 %v494_v58, %v493_v56  ;;  %v503_v60 = vadd.f32 %v502_v57, %v501_v55  ;;  %v888_v56 = vmov 2   ;;  %v889_v57 = vmov 3  }
 0x1cd   : > { %851 = vpush %v495_v59  ;;  %v504_v61 = vrot.slane %v503_v60, 1 }
 0x1cf   : > { %v505_v62 = vadd.f32 %v504_v61, %v503_v60 }
 0x1d1   : > { %853 = vpush %v505_v62 }
 0x1fe   : > { %s852_s28 = spop %851 }
 0x1ff   : > { %s497_s29 = smul.f32 0.00048828125, %s852_s28 }
 0x201   : > { %v517_v63 = vstv %s497_s29  ;;  %s508_s11 = smul.f32 %s497_s29, %s497_s29 }
 0x202   : > { %v518_v1 = vadd.f32 %v517_v63, %v971_v13  ;;  %s854_s12 = spop %853 }
 0x203   : > { %s507_s13 = smul.f32 0.00048828125, %s854_s12 }
 0x204   : > { %521 = vperm.xlu1 %872, %v518_v1  }
 0x205   : > { %s509_s15 = ssub.f32 %s507_s13, %s508_s11 }
 0x207   : > { %s510_s17 = smax.f32 %s887_s16, %s509_s15 }
 0x208   : > { %s511_s18 = sadd.f32 1e-05, %s510_s17 }
 0x20a   : > { %v512_v2 = vstv %s511_s18 }
 0x20b   : > { %875 = vrsqrt.f32 %v512_v2 }
 0x215   : > { %v876_v3 = vpop.eup %875 }
 0x216   : > { %855 = vpush %v876_v3 }
 0x247   : > { %s856_s21 = spop %855 }
 0x248   : > { %v515_v8 = vstv %s856_s21 }
 0x249   : > { %v516_v9 = vmul.f32 %v515_v8, %v375_v6 }
 0x24b   : > { %v533_v12 = vrot.slane %v516_v9, %v532_v7 }
 0x24d   : > { %v534_v13 = vmul.f32 %v533_v12, %v526_v10  ;;  %v535_v15 = vmul.f32 %v533_v12, %v527_v11  ;;  %v536_v19 = vmul.f32 %v533_v12, %v528_v17  ;;  %v537_v20 = vmul.f32 %v533_v12, %v529_v18 }
 0x24f   : > { %v538_v16 = vpack.c.bf16 %v535_v15, %v534_v13  ;;  %v539_v21 = vpack.c.bf16 %v537_v20, %v536_v19 }
 0x251   : > { %841 = vmatmul.mubr.msk.bf16.vlgmr.msra.gmra.mrb[0].mxu1 %vm389_vm0, %v538_v16 }
 0x252   : > { %647 = vmatprep.mubr.bf16.mxu1 %v885_v0 }
 0x259   : > { %842 = vmatmul.mubr.msk.bf16.gmra.mrb[4].mxu1 %vm389_vm0, %v539_v21 }
 0x283   : > { %v522_v23 = vpop.permute.xlu1 %521 }
 0x284   : > { %v524_v24 = vmul.f32 %v522_v23, %v516_v9 }
 0x286   : > { %v525_v25 = vsub.f32 %v376_v22, %v524_v24 }
 0x288   : > { %v543_v26 = vrot.slane %v525_v25, %v532_v7 }
 0x28a   : > { %v545_v27 = vmul.f32 %v543_v26, %v527_v11  ;;  %v544_v28 = vmul.f32 %v543_v26, %v526_v10  ;;  %v546_v0 = vmul.f32 %v543_v26, %v528_v17  ;;  %v547_v32 = vmul.f32 %v543_v26, %v529_v18 }
 0x28c   : > { %v551_v29 = vsel %vm389_vm0, %v545_v27, 0.0  ;;  %v548_v30 = vsel %vm389_vm0, %v544_v28, 0.0  ;;  %v554_v31 = vsel %vm389_vm0, %v546_v0, 0.0  ;;  %v557_v33 = vsel %vm389_vm0, %v547_v32, 0.0  ;;  %v568_v27 = vld [vmem:[%s1059_s8] sm:$0xf] }
 0x28d   : > { %552 = vadd.xlane.f32.xlu1 %v551_v29  ;;  %549 = vadd.xlane.f32.xlu0 %v548_v30 }
 0x291   : > { %555 = vadd.xlane.f32.xlu0 %v554_v31 }
 0x295   : > { %558 = vadd.xlane.f32.xlu0 %v557_v33 }
 0x31a   : > { %v553_v36 = vpop.xlane.xlu1 %552  ;;  %v550_v37 = vpop.xlane.xlu0 %549 }
 0x31b   : > { %v565_v40 = vadd.f32 %v561_v34, %v553_v36  ;;  %v564_v41 = vadd.f32 %v560_v35, %v550_v37 }
 0x31d   : > { %580 = vperm.xlu1 %872, %v565_v40   ;;  %575 = vperm.xlu0 %870, %v564_v41  }
 0x31e   : > { %v556_v43 = vpop.xlane.xlu0 %555 }
 0x31f   : > { %v566_v44 = vadd.f32 %v562_v42, %v556_v43 }
 0x321   : > { %585 = vperm.xlu0 %870, %v566_v44   ;;  %873 = vset.pattern.permute.xlu1 %v888_v56 }
 0x322   : > { %v559_v46 = vpop.xlane.xlu0 %558  ;;  %687 = vperm.xlu1 %873, %v976_v14  }
 0x323   : > { %v567_v47 = vadd.f32 %v563_v45, %v559_v46 }
 0x324   : > { %v639_v48 = vpop.f32.mrb[0].mxu1 }
 0x325   : > { %590 = vperm.xlu0 %870, %v567_v47   ;;  %v641_v49 = vpop.f32.mrb[1].mxu1 }
 0x326   : > { %v643_v50 = vpop.f32.mrb[2].mxu1 }
 0x327   : > { %v645_v51 = vpop.f32.mrb[3].mxu1 }
 0x329   : > { %874 = vset.pattern.permute.xlu0 %v889_v57 }
 0x32a   : > { %736 = vperm.xlu0 %874, %v976_v14  }
 0x32c   : > { %v649_v52 = vpop.f32.mrb[4].mxu1 }
 0x32d   : > { %v651_v53 = vpop.f32.mrb[5].mxu1 }
 0x32e   : > { %v653_v54 = vpop.f32.mrb[6].mxu1 }
 0x32f   : > { %v655_v55 = vpop.f32.mrb[7].mxu1 }
 0x39c   : > { %v581_v58 = vpop.permute.xlu1 %580  ;;  %v576_v59 = vpop.permute.xlu0 %575 }
 0x39d   : > { %v644_v60 = vadd.f32 %v643_v50, %v581_v58  ;;  %v646_v61 = vadd.f32 %v645_v51, %v581_v58  ;;  %v640_v62 = vadd.f32 %v639_v48, %v576_v59  ;;  %v642_v63 = vadd.f32 %v641_v49, %v576_v59 }
 0x39f   : > { %vm660_vm4 = vcmp.gt.f32.partialorder %v644_v60, 0.0  ;;  %vm661_vm5 = vcmp.gt.f32.partialorder %v646_v61, 0.0  ;;  %v668_v1 = vmul.f32 0.01, %v644_v60  ;;  %v669_v2 = vmul.f32 0.01, %v646_v61 }
 0x3a0   : > { %vm658_vm6 = vcmp.gt.f32.partialorder %v640_v62, 0.0  ;;  %vm659_vm7 = vcmp.gt.f32.partialorder %v642_v63, 0.0  ;;  %v666_v3 = vmul.f32 0.01, %v640_v62  ;;  %v667_v4 = vmul.f32 0.01, %v642_v63  ;;  %v586_v5 = vpop.permute.xlu0 %585 }
 0x3a1   : > { %v676_v6 = vsel %vm660_vm4, %v644_v60, %v668_v1  ;;  %v650_v7 = vadd.f32 %v649_v52, %v586_v5  ;;  %v652_v8 = vadd.f32 %v651_v53, %v586_v5  ;;  %v677_v9 = vsel %vm661_vm5, %v646_v61, %v669_v2  ;;  %v688_v28 = vpop.permute.xlu1 %687 }
 0x3a2   : > { %v674_v14 = vsel %vm658_vm6, %v640_v62, %v666_v3  ;;  %v675_v10 = vsel %vm659_vm7, %v642_v63, %v667_v4 }
 0x3a3   : > { %v682_v11 = vpack.c.bf16 %v676_v6, %v674_v14  ;;  %v683_v13 = vpack.c.bf16 %v677_v9, %v675_v10  ;;  %v670_v15 = vmul.f32 0.01, %v650_v7  ;;  %v671_v16 = vmul.f32 0.01, %v652_v8 }
 0x3a4   : > { %v591_v12 = vpop.permute.xlu0 %590  ;;  %vm662_vm8 = vcmp.gt.f32.partialorder %v650_v7, 0.0  ;;  %vm663_vm9 = vcmp.gt.f32.partialorder %v652_v8, 0.0 }
 0x3a5   : > { %v654_v17 = vadd.f32 %v653_v54, %v591_v12  ;;  %v656_v18 = vadd.f32 %v655_v55, %v591_v12  ;;  %694 = vmatprep.subr.bf16.mxu0 %v683_v13  ;;  %v678_v21 = vsel %vm662_vm8, %v650_v7, %v670_v15  ;;  %v679_v23 = vsel %vm663_vm9, %v652_v8, %v671_v16 }
 0x3a6   : > { %695 = vmatpush1.bf16.msra.mxu0 %v682_v11 }
 0x3a7   : > { %vm664_vm10 = vcmp.gt.f32.partialorder %v654_v17, 0.0  ;;  %vm665_vm11 = vcmp.gt.f32.partialorder %v656_v18, 0.0  ;;  %v672_v19 = vmul.f32 0.01, %v654_v17  ;;  %v673_v20 = vmul.f32 0.01, %v656_v18 }
 0x3a9   : > { %v680_v22 = vsel %vm664_vm10, %v654_v17, %v672_v19  ;;  %v681_v24 = vsel %vm665_vm11, %v656_v18, %v673_v20  ;;  %v737_v30 = vpop.permute.xlu0 %736 }
 0x3aa   : > { %v684_v25 = vpack.c.bf16 %v680_v22, %v678_v21  ;;  %v685_v26 = vpack.c.bf16 %v681_v24, %v679_v23 }
 0x3ac   : > { %696 = vmatprep.subr.bf16.mxu0 %v685_v26 }
 0x3ad   : > { %697 = vmatpush1.bf16.msra.mxu0 %v684_v25 }
 0x3b0   : > { %843 = vmatmul.mubr.msk.bf16.vlgmr.msra.gmra.mrb[4].mxu0 %vm690_vm12, %v568_v27 }
 0x483   : > { %v728_v29 = vpop.f32.mrb[4].mxu0 }
 0x484   : > { %v729_v0 = vadd.f32 %v728_v29, %v688_v28  ;;  %v730_v31 = vpop.f32.mrb[5].mxu0 }
 0x485   : > { %v731_v32 = vadd.f32 %v730_v31, %v688_v28  ;;  %v732_v33 = vpop.f32.mrb[6].mxu0 }
 0x486   : > { %v739_v34 = vmul.f32 %v737_v30, %v729_v0  ;;  %v733_v35 = vpop.f32.mrb[7].mxu0 }
 0x487   : > { %v740_v36 = vmul.f32 %v737_v30, %v731_v32 }
 0x488   : > { %v741_v37 = vadd.f32 %v739_v34, %v986_v38 }
 0x489   : > { %v742_v40 = vadd.f32 %v740_v36, %v988_v39 }
 0x48a   : > { %743 = vst [vmem:[%s369_s26] sm:$0xff] %v741_v37 }
 0x48b   : > { %744 = vst [vmem:[%s369_s26 + $0x8] sm:$0xff] %v742_v40 }
 0x48c PF: > { %s19_s30 = sadd.s32 1, %s883_s30  }
 0x48d   : > { %p16_p4 = scmp.ge.s32.totalorder %s19_s30, 4  }
 0x48f   :  { %18 = sbr.rel (!%p16_p4) target bundleno = 1 (0x1), region = 92 }

</bundles_post_ra>
